<compile_context>
chip_gen: v7x
topology: tpu7x:2x2x1
jax: 0.10.0
libtpu: 0.0.40
codegen_flags: <defaults>
</compile_context>

<pallas_src>
import jax
import jax.numpy as jnp
from jax.experimental import pallas as pl
from jax.experimental.pallas import tpu as pltpu

_LANE = 128
_LANE_CAP = 4096                   # max slab width (multiple of 128 lanes)
_ROW_ALIGN = 16                    # sublane alignment good for f32 (8) and bf16 (16)

_SINGLE_BLOCK_BYTES = 512 << 10    # <= 512 KiB -> one block, no pipeline steps
_TARGET_BLOCK_BYTES = 4 << 20      # ~4 MiB blocks (85%+ HBM roofline class on v6e)
_MIN_PIPELINE_STEPS = 4            # mid-size inputs still get >=4 blocks for overlap
_VMEM_LIMIT_BYTES = 32 << 20       # explicit scoped VMEM: > v5e's 16 MiB default,
                                   # < v7x 64 MiB physical; 16 MiB live + headroom

_RAGGED_SINGLE_BLOCK_BYTES = 1 << 20   # ragged inputs up to 1 MiB: one full block
_RAGGED_BLOCK_WIDTH = 32 * 1024        # lanes per block on the rare ragged path


def _sigmoid_kernel(x_ref, o_ref):
    x = x_ref[...].astype(jnp.float32)
    # sigmoid(x) = 0.5 * (tanh(0.5 * x) + 1): a single EUP transcendental,
    # numerically clean for large |x|, keeps VALU free for casts/scales.
    o_ref[...] = (0.5 * (jnp.tanh(0.5 * x) + 1.0)).astype(o_ref.dtype)


def _choose_width(n_elems: int) -> int:
    """Largest multiple of 128 that divides n_elems and is <= _LANE_CAP."""
    k_max = n_elems // _LANE
    for k in range(min(k_max, _LANE_CAP // _LANE), 0, -1):
        if k_max % k == 0:
            return k * _LANE
    return _LANE


def _choose_block_rows(rows: int, row_bytes: int, total_bytes: int) -> int:
    """Rows per block: ~_TARGET_BLOCK_BYTES, but at least _MIN_PIPELINE_STEPS
    blocks overall; sublane-aligned; prefer an exact divisor of `rows` so every
    grid step issues unmasked full stores (no vst.msk tail block)."""
    block_bytes = min(
        _TARGET_BLOCK_BYTES,
        max(row_bytes * _ROW_ALIGN, total_bytes // _MIN_PIPELINE_STEPS),
    )
    target = max(_ROW_ALIGN, block_bytes // row_bytes)
    target -= target % _ROW_ALIGN
    if target >= rows:
        return rows
    # Exact divisor of rows (multiple of _ROW_ALIGN), but only if it keeps
    # blocks within ~4x of the target size.
    d = target
    floor = max(_ROW_ALIGN, target // 4)
    while d >= floor:
        if rows % d == 0:
            return d
        d -= _ROW_ALIGN
    # No good divisor: last block is partial; Pallas masks its stores (correct,
    # only the final grid step pays the masked-store cost).
    return target


def _call_sigmoid(x2d, out_dtype, block_shape, index_map, grid, total):
    in_bytes = jnp.dtype(x2d.dtype).itemsize
    out_bytes = jnp.dtype(out_dtype).itemsize
    return pl.pallas_call(
        _sigmoid_kernel,
        out_shape=jax.ShapeDtypeStruct(x2d.shape, out_dtype),
        grid_spec=pltpu.PrefetchScalarGridSpec(
            num_scalar_prefetch=0,
            grid=grid,
            in_specs=[pl.BlockSpec(block_shape, index_map)],
            out_specs=pl.BlockSpec(block_shape, index_map),
        ),
        compiler_params=pltpu.CompilerParams(
            # Shards the mem-bound grid across v7x's 2 TensorCores; harmless
            # no-op on single-TC v5e / v6e.
            dimension_semantics=("parallel",),
            vmem_limit_bytes=_VMEM_LIMIT_BYTES,
        ),
        cost_estimate=pl.CostEstimate(
            flops=3 * total,
            transcendentals=total,
            bytes_accessed=total * (in_bytes + out_bytes),
        ),
    )(x2d)


def sigmoid_pallas(x: jax.Array) -> jax.Array:
    """Elementwise sigmoid via a Pallas TPU kernel. Accepts any shape."""
    orig_shape = x.shape
    in_dtype = x.dtype
    # Match torch.sigmoid: integer/bool inputs promote to float output.
    out_dtype = in_dtype if jnp.issubdtype(in_dtype, jnp.floating) else jnp.float32

    total = x.size
    if total == 0:
        return jnp.zeros(orig_shape, out_dtype)

    itemsize = jnp.dtype(in_dtype).itemsize
    total_bytes = total * itemsize
    flat = jnp.ravel(x)  # metadata-only reshape of a contiguous array

    if total % _LANE == 0:
        # Common path: lane-dense 2-D slab.
        width = _choose_width(total)
        rows = total // width
        x2d = flat.reshape(rows, width)
        if total_bytes <= _SINGLE_BLOCK_BYTES:
            # Tiny input: one block == full array dims (exempt from (8,128)).
            block_shape = (rows, width)
            grid = (1,)
        else:
            block_rows = _choose_block_rows(rows, width * itemsize, total_bytes)
            block_shape = (block_rows, width)
            grid = (pl.cdiv(rows, block_rows),)
        out2d = _call_sigmoid(x2d, out_dtype, block_shape,
                              lambda i: (i, 0), grid, total)
    else:
        # Rare ragged path (element count not a multiple of 128). No jnp.pad /
        # slice round-trip: either one full-array block (exempt from the
        # (8,128) rule) or lane-blocked with the partial last block masked by
        # Pallas. Layout is less dense here, but there is zero extra HBM traffic.
        x2d = flat.reshape(1, total)
        if total_bytes <= _RAGGED_SINGLE_BLOCK_BYTES:
            block_shape = (1, total)
            grid = (1,)
            index_map = lambda i: (0, 0)
        else:
            block_shape = (1, _RAGGED_BLOCK_WIDTH)
            grid = (pl.cdiv(total, _RAGGED_BLOCK_WIDTH),)
            index_map = lambda i: (0, i)
        out2d = _call_sigmoid(x2d, out_dtype, block_shape, index_map, grid, total)

    return out2d.reshape(orig_shape)


class NeuralNetworkPallas:
    """JAX/Pallas equivalent of the PyTorch NeuralNetwork module."""

    def __init__(self):
        # The module has no parameters; forward applies only sigmoid.
        pass

    def __call__(self, x: jax.Array) -> jax.Array:
        return sigmoid_pallas(x)


if __name__ == "__main__":
    model = NeuralNetworkPallas()

    # NCHW input at small shapes: batch=2, channels=4, spatial=16.
    key = jax.random.PRNGKey(0)
    x = jax.random.normal(key, (2, 4, 16, 16), dtype=jnp.float32)
    out = jax.block_until_ready(model(x))
    ref = jax.nn.sigmoid(x)
    assert out.shape == x.shape and out.dtype == x.dtype
    assert jnp.max(jnp.abs(out - ref)) < 1e-5

    # Exercise the multi-block pipelined path: 8 MiB f32 -> 4 blocks of 2 MiB.
    x_big = jax.random.normal(jax.random.PRNGKey(1), (512, 4096), dtype=jnp.float32)
    out_big = jax.block_until_ready(model(x_big))
    ref_big = jax.nn.sigmoid(x_big)
    assert out_big.shape == x_big.shape and out_big.dtype == x_big.dtype
    assert jnp.max(jnp.abs(out_big - ref_big)) < 1e-5

    print("KERNEL_OK")
</pallas_src>

<mosaic_0001>
module attributes {stable_mosaic.version = 11 : i64} {
  func.func @_sigmoid_kernel(%arg0: i32, %arg1: memref<1x2048xf32, #tpu.memory_space<vmem>>, %arg2: memref<1x2048xf32, #tpu.memory_space<vmem>>) attributes {dimension_semantics = [#tpu.dimension_semantics<parallel>], iteration_bounds = array<i64: 1>, scalar_prefetch = 0 : i64, scratch_operands = 0 : i64, tpu.core_type = #tpu.core_type<tc>, window_params = [{transform_indices = @transform_0, window_bounds = array<i64: 1, 2048>}, {transform_indices = @transform_1, window_bounds = array<i64: 1, 2048>}]} {
    %c0 = arith.constant 0 : index
    %c0_0 = arith.constant 0 : index
    %0 = vector.load %arg1[%c0, %c0_0] : memref<1x2048xf32, #tpu.memory_space<vmem>>, vector<1x2048xf32>
    %cst = arith.constant 5.000000e-01 : f32
    %1 = vector.broadcast %cst : f32 to vector<1x2048xf32>
    %2 = arith.mulf %1, %0 : vector<1x2048xf32>
    %3 = math.tanh %2 : vector<1x2048xf32>
    %cst_1 = arith.constant 1.000000e+00 : f32
    %4 = vector.broadcast %cst_1 : f32 to vector<1x2048xf32>
    %5 = arith.addf %3, %4 : vector<1x2048xf32>
    %cst_2 = arith.constant 5.000000e-01 : f32
    %6 = vector.broadcast %cst_2 : f32 to vector<1x2048xf32>
    %7 = arith.mulf %6, %5 : vector<1x2048xf32>
    %c0_3 = arith.constant 0 : index
    %c0_4 = arith.constant 0 : index
    %8 = vector.load %arg2[%c0_3, %c0_4] : memref<1x2048xf32, #tpu.memory_space<vmem>>, vector<1x2048xf32>
    tpu.vector_store %arg2[%c0_3, %c0_4], %7 {strides = array<i32>} : memref<1x2048xf32, #tpu.memory_space<vmem>>, vector<1x2048xf32>,
    return
  }
  func.func @transform_0(%arg0: i32) -> (i32, i32) {
    %c0_i32 = arith.constant 0 : i32
    %c0_i32_0 = arith.constant 0 : i32
    return %arg0, %c0_i32 : i32, i32
  }
  func.func @transform_1(%arg0: i32) -> (i32, i32) {
    %c0_i32 = arith.constant 0 : i32
    %c0_i32_0 = arith.constant 0 : i32
    return %arg0, %c0_i32 : i32, i32
  }
}

</mosaic_0001>

<bundles_post_ra>
// kernel: tpu_custom_call.1
= control target key start
LH: loop header
LB: loop body
LE: loop exit
PB: predicated region body
PF: predicated region fallthrough
CT: control target
= control target key end

     0   :  { %6 = vsyncpa [#allocation3], 0  ;;  %s138_s0 = inlined_call_operand.hbm [shape: f32[1,2048], index: 0, kind: input, shape index: {}]   ;;  %s139_s1 = inlined_call_operand.hbm [shape: f32[1,2048], index: 1, kind: output, shape index: {}]  }
   0x1   :  { %7 = vsyncpa [#allocation4], 0  ;;  %s102_s6 = smov [#allocation2]   ;;  %s54_s10 = scalar_lea.hbm %s138_s0, 256 }
   0x2   :  { %s14_s7 = sshll.u32 %s102_s6, 4  ;;  %p55_p0 = scmp.ne.s32.totalorder %s138_s0, %s54_s10  ;;  %s15_s7 = int_to_ptr.vmem [resolvable:$true] %s14_s7 }
   0x3   :  { %p58_p1 = scmp.lt.u32.totalorder %s54_s10, %s138_s0 }
   0x5   :  { %p60_p2 = pnand %p58_p1, %p55_p0 }
   0x7   :  { %63 = shalt.err (!%p60_p2)
}
   0x8   :  { %s64_s15 = scalar_lea.vmem %s15_s7, 256  ;;  %p69_p4 = scmp.lt.s32.totalorder %s15_s7, %s15_s7 }
   0x9   :  { %p65_p3 = scmp.ne.s32.totalorder %s15_s7, %s64_s15  ;;  %p70_p5 = scmp.lt.s32.totalorder %s64_s15, %s64_s15 }
   0xb   :  { %p71_p6 = por %p70_p5, %p69_p4 }
   0xd   :  { %p72_p7 = pnand %p71_p6, %p65_p3 }
   0xf   :  { %75 = shalt.err (!%p72_p7)
}
  0x10   :  { %17 = dma.hbm_to_vmem [thread:$0]  %s138_s0, 256, %s15_s7, [#allocation3]  }
  0x11   :  { %98 = dma.done.wait [#allocation3], 256  }
  0x12   :  { %99 = vsyncadd [#allocation3], 4294967040  ;;  %v21_v0 = vld [vmem:[#allocation2] sm:$0xff]  ;;  %v22_v1 = vld [vmem:[#allocation2 + $0x8] sm:$0xff]  ;;  %s103_s18 = smov [#allocation5]  }
  0x13   :  { %v23_v2 = vmul.f32 0.5, %v21_v0  ;;  %v24_v3 = vmul.f32 0.5, %v22_v1  ;;  %s39_s19 = sshll.u32 %s103_s18, 4  ;;  %s40_s19 = int_to_ptr.vmem [resolvable:$true] %s39_s19 }
  0x14   :  { %s76_s0 = scalar_lea.vmem %s40_s19, 256  ;;  %p81_p9 = scmp.lt.s32.totalorder %s40_s19, %s40_s19 }
  0x15   :  { %50 = vtanh.f32 %v23_v2  ;;  %p77_p8 = scmp.ne.s32.totalorder %s40_s19, %s76_s0  ;;  %p82_p10 = scmp.lt.s32.totalorder %s76_s0, %s76_s0 }
  0x16   :  { %52 = vtanh.f32 %v24_v3 }
  0x17   :  { %p83_p11 = por %p82_p10, %p81_p9 }
  0x19   :  { %p84_p12 = pnand %p83_p11, %p77_p8 }
  0x1f   :  { %v51_v4 = vpop.eup %50 }
  0x20   :  { %v53_v5 = vpop.eup %52  ;;  %v27_v6 = vadd.f32 1.0, %v51_v4 }
  0x21   :  { %v28_v7 = vadd.f32 1.0, %v53_v5 }
  0x22   :  { %v29_v8 = vmul.f32 0.5, %v27_v6 }
  0x23   :  { %v30_v9 = vmul.f32 0.5, %v28_v7 }
  0x24   :  { %31 = vst [vmem:[#allocation5] sm:$0xff] %v29_v8 }
  0x25   :  { %32 = vst [vmem:[#allocation5 + $0x8] sm:$0xff] %v30_v9 }
  0x26   :  { %87 = shalt.err (!%p84_p12)
}
  0x27   :  { %s88_s22 = scalar_lea.hbm %s139_s1, 256 }
  0x28   :  { %p89_p13 = scmp.ne.s32.totalorder %s139_s1, %s88_s22  ;;  %p92_p0 = scmp.lt.u32.totalorder %s88_s22, %s139_s1 }
  0x2a   :  { %p94_p1 = pnand %p92_p0, %p89_p13 }
  0x2c   :  { %97 = shalt.err (!%p94_p1)
}
  0x2d   :  { %42 = dma.vmem_to_hbm [thread:$0]  %s40_s19, 256, %s139_s1, [#allocation4]  }
  0x2e   :  { %100 = dma.done.wait [#allocation4], 256  }
  0x2f   :  { %101 = vsyncadd [#allocation4], 4294967040 }
  0x30   :  { %46 = vsyncpa [#allocation3], 1 }
  0x31   :  { %47 = vsyncpa [#allocation4], 1 }

</bundles_post_ra>
